<compile_context>
chip_gen: v7x
topology: tpu7x:2x2x1
jax: 0.10.0
libtpu: 0.0.40
codegen_flags: <defaults>
</compile_context>

<pallas_src>
import jax
import jax.numpy as jnp
from jax.experimental import pallas as pl
from jax.experimental.pallas import tpu as pltpu

HP, WP = 12, 12          # pooled spatial dims
NP = HP * WP             # 144 pooled positions
KTAPS = 25               # 5x5 conv taps
COUT = 20                # output channels
NSLOT = 4                # 2x2 pool-window slots


def conv_pool_kernel(p_ref, w_ref, o_ref):
    # p_ref: (4, 26, 144)  [pool slot, conv tap + ones row, pooled position]
    # w_ref: (20, 26)      [out channel, conv tap + bias column]
    # o_ref: (20, 144)     channel-major pooled output
    w = w_ref[...]
    acc = jnp.dot(w, p_ref[0], preferred_element_type=jnp.float32)
    for t in range(1, NSLOT):
        acc = jnp.maximum(
            acc, jnp.dot(w, p_ref[t], preferred_element_type=jnp.float32))
    o_ref[...] = acc


def model_forward(x, weight, bias):
    """x: (1,1,28,28) f32, weight: (20,1,5,5) f32, bias: (20,) f32 -> (1,20,12,12)."""
    x2d = x[0, 0]                                           # (28, 28)
    # im2col for the 24x24 valid-conv output, regrouped by 2x2 pool slot.
    taps = [x2d[ki:ki + 24, kj:kj + 24] for ki in range(5) for kj in range(5)]
    patches = jnp.stack(taps, axis=0)                       # (25, 24, 24) [tap, ci, cj]
    patches = patches.reshape(KTAPS, HP, 2, WP, 2)          # [tap, oi, di, oj, dj]
    patches = patches.transpose(2, 4, 0, 1, 3)              # [di, dj, tap, oi, oj]
    patches = patches.reshape(NSLOT, KTAPS, NP)             # (4, 25, 144)
    ones = jnp.ones((NSLOT, 1, NP), jnp.float32)
    patches = jnp.concatenate([patches, ones], axis=1)      # (4, 26, 144)

    # Weights with the bias folded in as the 26th contraction column.
    wb = jnp.concatenate(
        [weight.reshape(COUT, KTAPS), bias.reshape(COUT, 1)], axis=1)  # (20, 26)

    cost = pl.CostEstimate(
        flops=2 * NSLOT * COUT * (KTAPS + 1) * NP,
        transcendentals=0,
        bytes_accessed=(patches.size + wb.size + COUT * NP) * 4)

    out = pl.pallas_call(
        conv_pool_kernel,
        out_shape=jax.ShapeDtypeStruct((COUT, NP), jnp.float32),
        in_specs=[
            pl.BlockSpec(memory_space=pltpu.MemorySpace.VMEM),
            pl.BlockSpec(memory_space=pltpu.MemorySpace.VMEM),
        ],
        out_specs=pl.BlockSpec(memory_space=pltpu.MemorySpace.VMEM),
        cost_estimate=cost,
    )(patches, wb)

    # (20, 144) -> (1, 20, 12, 12): pure row-major reshape, no transpose.
    return out.reshape(1, COUT, HP, WP)


def reference_forward(x, weight, bias):
    conv = jax.lax.conv_general_dilated(
        x, weight, window_strides=(1, 1), padding="VALID",
        dimension_numbers=("NCHW", "OIHW", "NCHW"))
    conv = conv + bias.reshape(1, COUT, 1, 1)
    return jax.lax.reduce_window(
        conv, -jnp.inf, jax.lax.max,
        window_dimensions=(1, 1, 2, 2), window_strides=(1, 1, 2, 2),
        padding="VALID")


if __name__ == "__main__":
    key = jax.random.PRNGKey(0)
    kx, kw, kb = jax.random.split(key, 3)

    # Input consistent with the module: (1, 1, 28, 28)
    x = jax.random.normal(kx, (1, 1, 28, 28), dtype=jnp.float32)

    # Deterministic Conv2d(1, 20, 5) parameters (PyTorch-style uniform bounds).
    fan_in = 1 * 5 * 5
    bound = 1.0 / (fan_in ** 0.5)
    weight = jax.random.uniform(kw, (20, 1, 5, 5), jnp.float32, -bound, bound)
    bias = jax.random.uniform(kb, (20,), jnp.float32, -bound, bound)

    out = jax.block_until_ready(jax.jit(model_forward)(x, weight, bias))
    ref = jax.block_until_ready(reference_forward(x, weight, bias))

    assert out.shape == (1, 20, 12, 12), out.shape
    assert jnp.allclose(out, ref, atol=1e-4, rtol=1e-4), float(jnp.max(jnp.abs(out - ref)))
    print("KERNEL_OK")
</pallas_src>

<mosaic_0001>
module attributes {stable_mosaic.version = 11 : i64} {
  func.func @conv_pool_kernel(%arg0: memref<4x26x144xf32, #tpu.memory_space<vmem>>, %arg1: memref<20x26xf32, #tpu.memory_space<vmem>>, %arg2: memref<20x144xf32, #tpu.memory_space<vmem>>) attributes {dimension_semantics = [], scalar_prefetch = 0 : i64, scratch_operands = 0 : i64, tpu.core_type = #tpu.core_type<tc>} {
    %c0 = arith.constant 0 : index
    %c0_0 = arith.constant 0 : index
    %0 = vector.load %arg1[%c0, %c0_0] : memref<20x26xf32, #tpu.memory_space<vmem>>, vector<20x26xf32>
    %c0_1 = arith.constant 0 : index
    %c0_2 = arith.constant 0 : index
    %c0_3 = arith.constant 0 : index
    %1 = vector.load %arg0[%c0_1, %c0_2, %c0_3] : memref<4x26x144xf32, #tpu.memory_space<vmem>>, vector<1x26x144xf32>
    %2 = vector.shape_cast %1 : vector<1x26x144xf32> to vector<26x144xf32>
    %cst = arith.constant dense<0.000000e+00> : vector<20x144xf32>
    %3 = tpu.matmul %0, %2, %cst {dimension_numbers = #tpu.dot_dimension_numbers<[1], [0], [0], [1], [0, 0, 1, 1], [], []>} : vector<20x26xf32>, vector<26x144xf32>, vector<20x144xf32> -> vector<20x144xf32>
    %c1 = arith.constant 1 : index
    %c0_4 = arith.constant 0 : index
    %c0_5 = arith.constant 0 : index
    %4 = vector.load %arg0[%c1, %c0_4, %c0_5] : memref<4x26x144xf32, #tpu.memory_space<vmem>>, vector<1x26x144xf32>
    %5 = vector.shape_cast %4 : vector<1x26x144xf32> to vector<26x144xf32>
    %cst_6 = arith.constant dense<0.000000e+00> : vector<20x144xf32>
    %6 = tpu.matmul %0, %5, %cst_6 {dimension_numbers = #tpu.dot_dimension_numbers<[1], [0], [0], [1], [0, 0, 1, 1], [], []>} : vector<20x26xf32>, vector<26x144xf32>, vector<20x144xf32> -> vector<20x144xf32>
    %7 = arith.maximumf %3, %6 : vector<20x144xf32>
    %c2 = arith.constant 2 : index
    %c0_7 = arith.constant 0 : index
    %c0_8 = arith.constant 0 : index
    %8 = vector.load %arg0[%c2, %c0_7, %c0_8] : memref<4x26x144xf32, #tpu.memory_space<vmem>>, vector<1x26x144xf32>
    %9 = vector.shape_cast %8 : vector<1x26x144xf32> to vector<26x144xf32>
    %cst_9 = arith.constant dense<0.000000e+00> : vector<20x144xf32>
    %10 = tpu.matmul %0, %9, %cst_9 {dimension_numbers = #tpu.dot_dimension_numbers<[1], [0], [0], [1], [0, 0, 1, 1], [], []>} : vector<20x26xf32>, vector<26x144xf32>, vector<20x144xf32> -> vector<20x144xf32>
    %11 = arith.maximumf %7, %10 : vector<20x144xf32>
    %c3 = arith.constant 3 : index
    %c0_10 = arith.constant 0 : index
    %c0_11 = arith.constant 0 : index
    %12 = vector.load %arg0[%c3, %c0_10, %c0_11] : memref<4x26x144xf32, #tpu.memory_space<vmem>>, vector<1x26x144xf32>
    %13 = vector.shape_cast %12 : vector<1x26x144xf32> to vector<26x144xf32>
    %cst_12 = arith.constant dense<0.000000e+00> : vector<20x144xf32>
    %14 = tpu.matmul %0, %13, %cst_12 {dimension_numbers = #tpu.dot_dimension_numbers<[1], [0], [0], [1], [0, 0, 1, 1], [], []>} : vector<20x26xf32>, vector<26x144xf32>, vector<20x144xf32> -> vector<20x144xf32>
    %15 = arith.maximumf %11, %14 : vector<20x144xf32>
    %c0_13 = arith.constant 0 : index
    %c0_14 = arith.constant 0 : index
    %16 = vector.load %arg2[%c0_13, %c0_14] : memref<20x144xf32, #tpu.memory_space<vmem>>, vector<20x144xf32>
    tpu.vector_store %arg2[%c0_13, %c0_14], %15 {strides = array<i32>} : memref<20x144xf32, #tpu.memory_space<vmem>>, vector<20x144xf32>,
    return
  }
}

</mosaic_0001>

<bundles_post_ra>
// kernel: model_forward.1
= control target key start
LH: loop header
LB: loop body
LE: loop exit
PB: predicated region body
PF: predicated region fallthrough
CT: control target
= control target key end

     0   :  { %vm32_vm0 = vcmask 1041408   ;;  %v532_v3 = vmov 0.0   ;;  %vm533_vm1 = vmmov 1   ;;  %vm22_vm3 = vcmask 211968   ;;  %s719_s0 = inlined_call_operand.vmem [shape: f32[4,26,144], index: 0, kind: input, shape index: {}]   ;;  %s720_s1 = inlined_call_operand.vmem [shape: f32[20,26], index: 1, kind: input, shape index: {}]   ;;  %s721_s2 = inlined_call_operand.vmem [shape: f32[20,144], index: 2, kind: output, shape index: {}]  }
   0x1   :  { %v15_v0 = vld [vmem:[%s719_s0 + $0x8] sm:$0xff]  ;;  %v17_v1 = vld [vmem:[%s719_s0 + $0x18] sm:$0xff]  ;;  %103 = vmatprep.mubr.f32.mxu0 %v532_v3  ;;  %201 = vmatprep.mubr.f32.mxu1 %v532_v3  ;;  %v14_v6 = vld [vmem:[%s719_s0] sm:$0xff]  ;;  %vm435_vm4 = vcmask 130048   ;;  %vm440_vm5 = vcmask 125952  }
   0x2   :  { %v452_v2 = vld [vmem:[%s719_s0 + $0x48] sm:$0xff]  ;;  %v490_v4 = vpack.c.bf16 %v17_v1, %v15_v0  ;;  %v454_v5 = vld [vmem:[%s719_s0 + $0x58] sm:$0xff]  ;;  %v16_v7 = vld [vmem:[%s719_s0 + $0x10] sm:$0xff] }
   0x3   :  { %v500_v8 = vpack.c.bf16 %v454_v5, %v452_v2  ;;  %v492_v9 = vpack.c.bf16 %v16_v7, %v14_v6  ;;  %v451_v10 = vld [vmem:[%s719_s0 + $0x40] sm:$0xff]  ;;  %v453_v11 = vld [vmem:[%s719_s0 + $0x50] sm:$0xff]  ;;  %v19_v12 = vld [vmem:[%s719_s0 + $0x28] sm:$0xff] }
   0x4   :  { %491 = vmatprep.subr.bf16.mxu0 %v490_v4  ;;  %v502_v13 = vpack.c.bf16 %v453_v11, %v451_v10  ;;  %v21_v14 = vld [vmem:[%s719_s0 + $0x38] sm:$0x3]  ;;  %vm582_vm2 = vmpackc.low %vm32_vm0, %vm533_vm1  ;;  %v456_v16 = vld [vmem:[%s719_s0 + $0x68] sm:$0xff] }
   0x5   :  { %501 = vmatprep.subr.bf16.mxu1 %v500_v8  ;;  %493 = vmatpush1.bf16.msra.mxu0 %v492_v9  ;;  %v494_v17 = vpack.c.bf16 %v21_v14, %v19_v12  ;;  %v458_v18 = vld [vmem:[%s719_s0 + $0x78] sm:$0x3]  ;;  %v18_v19 = vld [vmem:[%s719_s0 + $0x20] sm:$0xff]  ;;  %v20_v20 = vld [vmem:[%s719_s0 + $0x30] sm:$0x3] }
   0x6   :  { %503 = vmatpush1.bf16.msra.mxu1 %v502_v13  ;;  %v504_v21 = vpack.c.bf16 %v458_v18, %v456_v16  ;;  %v497_v22 = vpack.c.bf16 %v20_v20, %v18_v19  ;;  %v455_v23 = vld [vmem:[%s719_s0 + $0x60] sm:$0xff]  ;;  %v457_v24 = vld [vmem:[%s719_s0 + $0x70] sm:$0x3]  ;;  %v465_v26 = vld [vmem:[%s719_s0 + $0x88] sm:$0xff] }
   0x7   :  { %496 = vmatprep.subr.msk.bf16.mxu0 %vm582_vm2, %v494_v17  ;;  %v507_v25 = vpack.c.bf16 %v457_v24, %v455_v23  ;;  %v467_v27 = vld [vmem:[%s719_s0 + $0x98] sm:$0xff]  ;;  %v464_v28 = vld [vmem:[%s719_s0 + $0x80] sm:$0xff]  ;;  %v466_v30 = vld [vmem:[%s719_s0 + $0x90] sm:$0xff] }
   0x8   :  { %506 = vmatprep.subr.msk.bf16.mxu1 %vm582_vm2, %v504_v21  ;;  %v510_v29 = vpack.c.bf16 %v467_v27, %v465_v26  ;;  %v478_v31 = vld [vmem:[%s719_s0 + $0xc8] sm:$0xff]  ;;  %v480_v32 = vld [vmem:[%s719_s0 + $0xd8] sm:$0xff]  ;;  %v11_v33 = vld [vmem:[%s720_s1] sm:$0xff]  ;;  %v512_v34 = vpack.c.bf16 %v466_v30, %v464_v28 }
   0x9   :  { %499 = vmatpush1.bf16.msk.msra.mxu0 %vm582_vm2, %v497_v22  ;;  %v520_v35 = vpack.c.bf16 %v480_v32, %v478_v31  ;;  %v477_v36 = vld [vmem:[%s719_s0 + $0xc0] sm:$0xff]  ;;  %v479_v37 = vld [vmem:[%s719_s0 + $0xd0] sm:$0xff]  ;;  %v469_v38 = vld [vmem:[%s719_s0 + $0xa8] sm:$0xff] }
   0xa   :  { %509 = vmatpush1.bf16.msk.msra.mxu1 %vm582_vm2, %v507_v25  ;;  %511 = vmatprep.subr.bf16.mxu0 %v510_v29  ;;  %v471_v39 = vld [vmem:[%s719_s0 + $0xb8] sm:$0x3]  ;;  %v522_v40 = vpack.c.bf16 %v479_v37, %v477_v36  ;;  %v468_v42 = vld [vmem:[%s719_s0 + $0xa0] sm:$0xff]  ;;  %v470_v43 = vld [vmem:[%s719_s0 + $0xb0] sm:$0x3] }
   0xb   :  { %521 = vmatprep.subr.bf16.mxu1 %v520_v35  ;;  %v514_v41 = vpack.c.bf16 %v471_v39, %v469_v38  ;;  %v482_v44 = vld [vmem:[%s719_s0 + $0xe8] sm:$0xff]  ;;  %v484_v45 = vld [vmem:[%s719_s0 + $0xf8] sm:$0x3]  ;;  %v481_v46 = vld [vmem:[%s719_s0 + $0xe0] sm:$0xff]  ;;  %v517_v50 = vpack.c.bf16 %v470_v43, %v468_v42 }
   0xc   :  { %448 = vmatmul.mubr.msk.f32.vlgmr.msra.gmra.mrb[0].mxu0 %vm22_vm3, %v11_v33  ;;  %v483_v47 = vld [vmem:[%s719_s0 + $0xf0] sm:$0x3]  ;;  %v12_v48 = vld [vmem:[%s720_s1 + $0x8] sm:$0xff]  ;;  %v524_v49 = vpack.c.bf16 %v484_v45, %v482_v44 }
   0xd   :  { %461 = vmatmul.mubr.msk.f32.vlgmr.msra.gmra.mrb[0].mxu1 %vm22_vm3, %v11_v33  ;;  %513 = vmatpush1.bf16.msra.mxu0 %v512_v34  ;;  %v527_v51 = vpack.c.bf16 %v483_v47, %v481_v46  ;;  %v13_v52 = vld [vmem:[%s720_s1 + $0x10] sm:$0xf] }
   0xe   :  { %109 = vmatprep.mubr.f32.mxu0 %v532_v3  ;;  %207 = vmatprep.mubr.f32.mxu1 %v532_v3 }
   0xf   :  { %523 = vmatpush1.bf16.msra.mxu1 %v522_v40  ;;  %516 = vmatprep.subr.msk.bf16.mxu0 %vm582_vm2, %v514_v41 }
  0x10   :  { %449 = vmatmul.mubr.msk.f32.gmra.mrb[2].mxu0 %vm22_vm3, %v12_v48  ;;  %526 = vmatprep.subr.msk.bf16.mxu1 %vm582_vm2, %v524_v49 }
  0x11   :  { %462 = vmatmul.mubr.msk.f32.gmra.mrb[2].mxu1 %vm22_vm3, %v12_v48  ;;  %115 = vmatprep.mubr.f32.mxu0 %v532_v3 }
  0x12   :  { %213 = vmatprep.mubr.f32.mxu1 %v532_v3  ;;  %519 = vmatpush1.bf16.msk.msra.mxu0 %vm582_vm2, %v517_v50 }
  0x13   :  { %529 = vmatpush1.bf16.msk.msra.mxu1 %vm582_vm2, %v527_v51 }
  0x14   :  { %450 = vmatmul.mubr.msk.f32.gmra.mrb[4].mxu0 %vm22_vm3, %v13_v52 }
  0x15   :  { %463 = vmatmul.mubr.msk.f32.gmra.mrb[4].mxu1 %vm22_vm3, %v13_v52  ;;  %305 = vmatprep.mubr.f32.mxu0 %v532_v3 }
  0x16   :  { %409 = vmatprep.mubr.f32.mxu1 %v532_v3 }
  0x18   :  { %474 = vmatmul.mubr.msk.f32.vlgmr.msra.gmra.mrb[6].mxu0 %vm22_vm3, %v11_v33 }
  0x19   :  { %487 = vmatmul.mubr.msk.f32.vlgmr.msra.gmra.mrb[6].mxu1 %vm22_vm3, %v11_v33  ;;  %311 = vmatprep.mubr.f32.mxu0 %v532_v3 }
  0x1a   :  { %415 = vmatprep.mubr.f32.mxu1 %v532_v3 }
  0x1c   :  { %475 = vmatmul.mubr.msk.f32.gmra.mrb[8].mxu0 %vm22_vm3, %v12_v48 }
  0x1d   :  { %488 = vmatmul.mubr.msk.f32.gmra.mrb[8].mxu1 %vm22_vm3, %v12_v48  ;;  %317 = vmatprep.mubr.f32.mxu0 %v532_v3 }
  0x1e   :  { %421 = vmatprep.mubr.f32.mxu1 %v532_v3 }
  0x20   :  { %476 = vmatmul.mubr.msk.f32.gmra.mrb[10].mxu0 %vm22_vm3, %v13_v52 }
  0x21   :  { %489 = vmatmul.mubr.msk.f32.gmra.mrb[10].mxu1 %vm22_vm3, %v13_v52 }
  0xdf   :  { %v105_v53 = vpop.f32.mrb[0].mxu0 }
  0xe0   :  { %v203_v54 = vpop.f32.mrb[0].mxu1  ;;  %v107_v55 = vpop.f32.mrb[1].mxu0 }
  0xe1   :  { %v220_v56 = vmax.f32 %v105_v53, %v203_v54  ;;  %v205_v57 = vpop.f32.mrb[1].mxu1 }
  0xe2   :  { %v221_v58 = vmax.f32 %v107_v55, %v205_v57 }
  0xe3   :  { %v111_v59 = vpop.f32.mrb[2].mxu0 }
  0xe4   :  { %v209_v60 = vpop.f32.mrb[2].mxu1  ;;  %v113_v61 = vpop.f32.mrb[3].mxu0 }
  0xe5   :  { %v222_v62 = vmax.f32 %v111_v59, %v209_v60  ;;  %v211_v63 = vpop.f32.mrb[3].mxu1 }
  0xe6   :  { %v223_v0 = vmax.f32 %v113_v61, %v211_v63 }
  0xe7   :  { %v117_v1 = vpop.f32.mrb[4].mxu0 }
  0xe8   :  { %v215_v2 = vpop.f32.mrb[4].mxu1  ;;  %v119_v4 = vpop.f32.mrb[5].mxu0 }
  0xe9   :  { %v224_v3 = vmax.f32 %v117_v1, %v215_v2  ;;  %v217_v5 = vpop.f32.mrb[5].mxu1 }
  0xea   :  { %v225_v6 = vmax.f32 %v119_v4, %v217_v5 }
  0xeb   :  { %v307_v7 = vpop.f32.mrb[6].mxu0 }
  0xec   :  { %v324_v8 = vmax.f32 %v220_v56, %v307_v7  ;;  %v309_v9 = vpop.f32.mrb[7].mxu0  ;;  %v411_v10 = vpop.f32.mrb[6].mxu1 }
  0xed   :  { %v325_v11 = vmax.f32 %v221_v58, %v309_v9  ;;  %v413_v12 = vpop.f32.mrb[7].mxu1 }
  0xee   :  { %v428_v13 = vmax.f32 %v324_v8, %v411_v10 }
  0xef   :  { %v429_v14 = vmax.f32 %v325_v11, %v413_v12  ;;  %v313_v15 = vpop.f32.mrb[8].mxu0 }
  0xf0   :  { %434 = vst [vmem:[%s721_s2] sm:$0xff] %v428_v13  ;;  %v326_v16 = vmax.f32 %v222_v62, %v313_v15  ;;  %v315_v17 = vpop.f32.mrb[9].mxu0  ;;  %v417_v18 = vpop.f32.mrb[8].mxu1 }
  0xf1   :  { %436 = vst.msk [vmem:[%s721_s2 + $0x8] sm:$0xff] %vm435_vm4, %v429_v14  ;;  %v327_v19 = vmax.f32 %v223_v0, %v315_v17  ;;  %v419_v20 = vpop.f32.mrb[9].mxu1 }
  0xf2   :  { %v430_v21 = vmax.f32 %v326_v16, %v417_v18 }
  0xf3   :  { %v431_v22 = vmax.f32 %v327_v19, %v419_v20  ;;  %v319_v23 = vpop.f32.mrb[10].mxu0 }
  0xf4   :  { %437 = vst [vmem:[%s721_s2 + $0x10] sm:$0xff] %v430_v21  ;;  %v328_v24 = vmax.f32 %v224_v3, %v319_v23  ;;  %v321_v25 = vpop.f32.mrb[11].mxu0  ;;  %v423_v26 = vpop.f32.mrb[10].mxu1 }
  0xf5   :  { %438 = vst.msk [vmem:[%s721_s2 + $0x18] sm:$0xff] %vm435_vm4, %v431_v22  ;;  %v329_v27 = vmax.f32 %v225_v6, %v321_v25  ;;  %v425_v28 = vpop.f32.mrb[11].mxu1 }
  0xf6   :  { %v432_v29 = vmax.f32 %v328_v24, %v423_v26 }
  0xf7   :  { %v433_v30 = vmax.f32 %v329_v27, %v425_v28 }
  0xf8   :  { %439 = vst [vmem:[%s721_s2 + $0x20] sm:$0xf] %v432_v29 }
  0xf9   :  { %441 = vst.msk [vmem:[%s721_s2 + $0x28] sm:$0xf] %vm440_vm5, %v433_v30 }

</bundles_post_ra>
